<compile_context>
chip_gen: v7x
topology: tpu7x:2x2x1
jax: 0.10.0
libtpu: 0.0.40
codegen_flags: <defaults>
</compile_context>

<pallas_src>
import math

import jax
import jax.numpy as jnp
import numpy as np
from jax.experimental import pallas as pl
from jax.experimental.pallas import tpu as pltpu

# ----- configuration (mirrors PhysNetRepresentation.__init__ arguments) --------
MAX_INTERACTION_RADIUS_NM = 0.5   # maximum_interaction_radius (= 5 Angstrom), in nm
MIN_DISTANCE_NM = 0.0             # PhysNetRadialBasisFunction min_distance
ALPHA_NM = 0.1                    # PhysNet RBF alpha (= 1 Angstrom), in nm
NUM_RBF = 16                      # number_of_radial_basis_functions
MAX_ATOMIC_NUMBER = 20            # featurization_config["maximum_atomic_number"]
NUM_PER_ATOM_FEATURES = 32        # featurization_config["number_of_per_atom_features"]

# Tiling: pairs on lanes (large lane-dense blocks), atoms on sublanes.
PAIR_LANE_TILE = 2048             # pairs per grid step (lane multiple of 128)
ATOM_TILE = 128                   # atoms per grid step (sublane multiple of 8)

# Compile-time RBF constants (baked into the kernel).
_RBF_START = math.exp(-(MAX_INTERACTION_RADIUS_NM - MIN_DISTANCE_NM) / ALPHA_NM)
_RBF_STEP = (1.0 - _RBF_START) / (NUM_RBF - 1)
_INV_SIGMA = NUM_RBF / (2.0 * (1.0 - _RBF_START))
_INV_ALPHA = 1.0 / ALPHA_NM
_PI_OVER_RCUT = math.pi / MAX_INTERACTION_RADIUS_NM


def _round_up(x, m):
    return ((x + m - 1) // m) * m


# ----------------------------- Pallas kernels ----------------------------------
def _rbf_cutoff_kernel(d_ref, fij_ref, cut_ref):
    """Fused PhysNet RBF expansion + cosine attenuation, lane-dense over pairs.

    d_ref   : (1, T)        distances (nm), pairs on lanes
    fij_ref : (NUM_RBF, T)  RBF expansion (channels on sublanes, pairs on lanes)
    cut_ref : (1, T)        cosine cutoff
    """
    d = d_ref[...]                                        # (1, T) f32
    # PhysNet radial basis: Gaussian in exp(-d/alpha) space.
    x = jnp.exp(-(d - MIN_DISTANCE_NM) * _INV_ALPHA)      # (1, T)
    k = jax.lax.broadcasted_iota(jnp.int32, (NUM_RBF, 1), 0).astype(jnp.float32)
    mu = _RBF_START + k * _RBF_STEP                       # (NUM_RBF, 1) baked linspace
    z = (x - mu) * _INV_SIGMA                             # broadcast -> (NUM_RBF, T)
    fij_ref[...] = jnp.exp(-(z * z))
    # CosineAttenuationFunction: 0.5*(cos(pi*d/r_cut)+1) inside cutoff, 0 outside.
    c = 0.5 * (jnp.cos(d * _PI_OVER_RCUT) + 1.0)
    cut_ref[...] = jnp.where(d < MAX_INTERACTION_RADIUS_NM, c, 0.0)


def _embedding_kernel(z_ref, table_ref, out_ref):
    """Embedding lookup for one tile of atoms, done as one-hot @ table (MXU)."""
    z = z_ref[...]                                        # (ATOM_TILE, 1) int32
    n_types = table_ref.shape[0]
    iota = jax.lax.broadcasted_iota(jnp.int32, (z.shape[0], n_types), 1)
    onehot = (iota == z).astype(jnp.float32)              # (ATOM_TILE, n_types)
    # NOTE: Z >= MAX_ATOMIC_NUMBER silently maps to a zero vector (nn.Embedding
    # would raise an index error instead).
    out_ref[...] = jnp.dot(onehot, table_ref[...],
                           preferred_element_type=jnp.float32)


# ----------------------------- parameter setup ----------------------------------
def make_physnet_parameters(key):
    """Deterministic parameters matching the shapes created in __init__."""
    # FeaturizeInput -> nn.Embedding(maximum_atomic_number, number_of_per_atom_features)
    table = jax.random.normal(
        key, (MAX_ATOMIC_NUMBER, NUM_PER_ATOM_FEATURES), dtype=jnp.float32)
    return table


# ------------------------------ wrapper -----------------------------------------
def physnet_representation(d_ij, atomic_numbers, embedding_table):
    """
    d_ij           : (n_pairs, 1) float32 distances in nm
    atomic_numbers : (n_atoms,)   int32
    returns dict {"f_ij", "f_ij_cutoff", "atomic_embedding"}
    """
    n_pairs = d_ij.shape[0]
    n_atoms = atomic_numbers.shape[0]

    # --- pairwise path (RBF + cutoff): pairs on the lane axis, lane-dense blocks ---
    if n_pairs == 0:
        f_ij = jnp.zeros((0, NUM_RBF), jnp.float32)
        f_ij_cutoff = jnp.zeros((0, 1), jnp.float32)
    else:
        tile = min(PAIR_LANE_TILE, _round_up(n_pairs, 128))
        P = _round_up(n_pairs, tile)
        d_row = jnp.pad(d_ij.astype(jnp.float32).reshape(1, n_pairs),
                        ((0, 0), (0, P - n_pairs)))        # (1, P)

        f_ij_t, cut_t = pl.pallas_call(
            _rbf_cutoff_kernel,
            out_shape=(jax.ShapeDtypeStruct((NUM_RBF, P), jnp.float32),
                       jax.ShapeDtypeStruct((1, P), jnp.float32)),
            grid_spec=pltpu.PrefetchScalarGridSpec(
                num_scalar_prefetch=0,
                grid=(P // tile,),
                in_specs=[pl.BlockSpec((1, tile), lambda i: (0, i))],
                out_specs=[pl.BlockSpec((NUM_RBF, tile), lambda i: (0, i)),
                           pl.BlockSpec((1, tile), lambda i: (0, i))]),
            compiler_params=pltpu.CompilerParams(
                dimension_semantics=("parallel",)),
        )(d_row)

        # Layout plumbing back to the module's (n_pairs, K) / (n_pairs, 1) views.
        f_ij = f_ij_t.T[:n_pairs]                          # (n_pairs, NUM_RBF)
        f_ij_cutoff = cut_t.reshape(P, 1)[:n_pairs]        # (n_pairs, 1)

    # --- per-atom path (embedding lookup), atoms padded to a multiple of ATOM_TILE ---
    if n_atoms == 0:
        atomic_embedding = jnp.zeros((0, NUM_PER_ATOM_FEATURES), jnp.float32)
    else:
        A = _round_up(n_atoms, ATOM_TILE)
        z_pad = jnp.pad(atomic_numbers.astype(jnp.int32),
                        ((0, A - n_atoms),))[:, None]       # (A, 1)

        emb_pad = pl.pallas_call(
            _embedding_kernel,
            out_shape=jax.ShapeDtypeStruct((A, NUM_PER_ATOM_FEATURES), jnp.float32),
            grid_spec=pltpu.PrefetchScalarGridSpec(
                num_scalar_prefetch=0,
                grid=(A // ATOM_TILE,),
                in_specs=[pl.BlockSpec((ATOM_TILE, 1), lambda i: (i, 0)),
                          pl.BlockSpec((MAX_ATOMIC_NUMBER, NUM_PER_ATOM_FEATURES),
                                       lambda i: (0, 0))],
                out_specs=pl.BlockSpec((ATOM_TILE, NUM_PER_ATOM_FEATURES),
                                       lambda i: (i, 0))),
            compiler_params=pltpu.CompilerParams(
                dimension_semantics=("parallel",)),
        )(z_pad, embedding_table)
        atomic_embedding = emb_pad[:n_atoms]               # (n_atoms, F)

    # TODO(synk): FeaturizeInput's optional appended per-atom properties + mixing
    #             MLP path (used when featurizing more than "atomic_number") is
    #             not implemented; only the plain embedding lookup is.
    return {
        "f_ij": f_ij,                       # (n_pairs, NUM_RBF)  (.squeeze())
        "f_ij_cutoff": f_ij_cutoff,         # (n_pairs, 1)
        "atomic_embedding": atomic_embedding,  # (n_atoms, NUM_PER_ATOM_FEATURES)
    }


# ------------------------------ reference ---------------------------------------
def physnet_representation_ref(d_ij, atomic_numbers, table):
    start = math.exp(-(MAX_INTERACTION_RADIUS_NM - MIN_DISTANCE_NM) / ALPHA_NM)
    centers = jnp.linspace(start, 1.0, NUM_RBF, dtype=jnp.float32)
    sigma = 2.0 * (1.0 - start) / NUM_RBF
    x = jnp.exp(-(d_ij - MIN_DISTANCE_NM) / ALPHA_NM)            # (P, 1)
    z = (x - centers[None, :]) / sigma
    f_ij = jnp.exp(-(z * z))
    c = 0.5 * (jnp.cos(jnp.pi * d_ij / MAX_INTERACTION_RADIUS_NM) + 1.0)
    cut = jnp.where(d_ij < MAX_INTERACTION_RADIUS_NM, c, 0.0)
    emb = table[atomic_numbers]
    return {"f_ij": f_ij, "f_ij_cutoff": cut, "atomic_embedding": emb}


# --------------------------------- main ------------------------------------------
if __name__ == "__main__":
    key = jax.random.PRNGKey(0)
    k_d, k_z, k_emb = jax.random.split(key, 3)

    n_pairs, n_atoms = 24, 10
    # distances (nm) spanning both sides of the 0.5 nm cutoff
    d_ij = jax.random.uniform(k_d, (n_pairs, 1), minval=0.05, maxval=0.65,
                              dtype=jnp.float32)
    atomic_numbers = jax.random.randint(k_z, (n_atoms,), 1, MAX_ATOMIC_NUMBER,
                                        dtype=jnp.int32)

    table = make_physnet_parameters(k_emb)

    out = physnet_representation(d_ij, atomic_numbers, table)
    out = jax.tree_util.tree_map(jax.block_until_ready, out)

    ref = physnet_representation_ref(d_ij, atomic_numbers, table)
    for name in ("f_ij", "f_ij_cutoff", "atomic_embedding"):
        np.testing.assert_allclose(np.asarray(out[name]), np.asarray(ref[name]),
                                   rtol=1e-4, atol=1e-5)
    assert out["f_ij"].shape == (n_pairs, NUM_RBF)
    assert out["f_ij_cutoff"].shape == (n_pairs, 1)
    assert out["atomic_embedding"].shape == (n_atoms, NUM_PER_ATOM_FEATURES)

    print("KERNEL_OK")
</pallas_src>

<mosaic_0001>
module attributes {stable_mosaic.version = 11 : i64} {
  func.func @_rbf_cutoff_kernel(%arg0: i32, %arg1: memref<1x128xf32, #tpu.memory_space<vmem>>, %arg2: memref<16x128xf32, #tpu.memory_space<vmem>>, %arg3: memref<1x128xf32, #tpu.memory_space<vmem>>) attributes {dimension_semantics = [#tpu.dimension_semantics<parallel>], iteration_bounds = array<i64: 1>, scalar_prefetch = 0 : i64, scratch_operands = 0 : i64, tpu.core_type = #tpu.core_type<tc>, window_params = [{transform_indices = @transform_0, window_bounds = array<i64: 1, 128>}, {transform_indices = @transform_1, window_bounds = array<i64: 16, 128>}, {transform_indices = @transform_2, window_bounds = array<i64: 1, 128>}]} {
    %c0 = arith.constant 0 : index
    %c0_0 = arith.constant 0 : index
    %0 = vector.load %arg1[%c0, %c0_0] : memref<1x128xf32, #tpu.memory_space<vmem>>, vector<1x128xf32>
    %cst = arith.constant 0.000000e+00 : f32
    %1 = vector.broadcast %cst : f32 to vector<1x128xf32>
    %2 = arith.subf %0, %1 : vector<1x128xf32>
    %cst_1 = arith.constant 0.000000e+00 : f32
    %3 = vector.broadcast %cst_1 : f32 to vector<1x128xf32>
    %4 = arith.subf %3, %2 : vector<1x128xf32>
    %cst_2 = arith.constant 1.000000e+01 : f32
    %5 = vector.broadcast %cst_2 : f32 to vector<1x128xf32>
    %6 = arith.mulf %4, %5 : vector<1x128xf32>
    %7 = math.exp %6 : vector<1x128xf32>
    %8 = tpu.iota {dimensions = array<i32: 0>} : vector<16x1xi32>
    %9 = arith.sitofp %8 : vector<16x1xi32> to vector<16x1xf32>
    %cst_3 = arith.constant 0.0662174672 : f32
    %10 = vector.broadcast %cst_3 : f32 to vector<16x1xf32>
    %11 = arith.mulf %9, %10 : vector<16x1xf32>
    %cst_4 = arith.constant 0.006737947 : f32
    %12 = vector.broadcast %cst_4 : f32 to vector<16x1xf32>
    %13 = arith.addf %12, %11 : vector<16x1xf32>
    %14 = vector.broadcast %7 : vector<1x128xf32> to vector<16x128xf32>
    %15 = vector.broadcast %13 : vector<16x1xf32> to vector<16x128xf32>
    %16 = arith.subf %14, %15 : vector<16x128xf32>
    %cst_5 = arith.constant 8.05426883 : f32
    %17 = vector.broadcast %cst_5 : f32 to vector<16x128xf32>
    %18 = arith.mulf %16, %17 : vector<16x128xf32>
    %19 = arith.mulf %18, %18 : vector<16x128xf32>
    %cst_6 = arith.constant 0.000000e+00 : f32
    %20 = vector.broadcast %cst_6 : f32 to vector<16x128xf32>
    %21 = arith.subf %20, %19 : vector<16x128xf32>
    %22 = math.exp %21 : vector<16x128xf32>
    %c0_7 = arith.constant 0 : index
    %c0_8 = arith.constant 0 : index
    %23 = vector.load %arg2[%c0_7, %c0_8] : memref<16x128xf32, #tpu.memory_space<vmem>>, vector<16x128xf32>
    tpu.vector_store %arg2[%c0_7, %c0_8], %22 {strides = array<i32>} : memref<16x128xf32, #tpu.memory_space<vmem>>, vector<16x128xf32>,
    %cst_9 = arith.constant 6.28318548 : f32
    %24 = vector.broadcast %cst_9 : f32 to vector<1x128xf32>
    %25 = arith.mulf %0, %24 : vector<1x128xf32>
    %26 = math.cos %25 : vector<1x128xf32>
    %cst_10 = arith.constant 1.000000e+00 : f32
    %27 = vector.broadcast %cst_10 : f32 to vector<1x128xf32>
    %28 = arith.addf %26, %27 : vector<1x128xf32>
    %cst_11 = arith.constant 5.000000e-01 : f32
    %29 = vector.broadcast %cst_11 : f32 to vector<1x128xf32>
    %30 = arith.mulf %29, %28 : vector<1x128xf32>
    %cst_12 = arith.constant 5.000000e-01 : f32
    %31 = vector.broadcast %cst_12 : f32 to vector<1x128xf32>
    %32 = arith.cmpf olt, %0, %31 : vector<1x128xf32>
    %cst_13 = arith.constant 0.000000e+00 : f32
    %33 = vector.broadcast %cst_13 : f32 to vector<1x128xf32>
    %34 = arith.select %32, %30, %33 : vector<1x128xi1>, vector<1x128xf32>
    %c0_14 = arith.constant 0 : index
    %c0_15 = arith.constant 0 : index
    %35 = vector.load %arg3[%c0_14, %c0_15] : memref<1x128xf32, #tpu.memory_space<vmem>>, vector<1x128xf32>
    tpu.vector_store %arg3[%c0_14, %c0_15], %34 {strides = array<i32>} : memref<1x128xf32, #tpu.memory_space<vmem>>, vector<1x128xf32>,
    return
  }
  func.func @transform_0(%arg0: i32) -> (i32, i32) {
    %c0_i32 = arith.constant 0 : i32
    %c0_i32_0 = arith.constant 0 : i32
    return %c0_i32, %arg0 : i32, i32
  }
  func.func @transform_1(%arg0: i32) -> (i32, i32) {
    %c0_i32 = arith.constant 0 : i32
    %c0_i32_0 = arith.constant 0 : i32
    return %c0_i32, %arg0 : i32, i32
  }
  func.func @transform_2(%arg0: i32) -> (i32, i32) {
    %c0_i32 = arith.constant 0 : i32
    %c0_i32_0 = arith.constant 0 : i32
    return %c0_i32, %arg0 : i32, i32
  }
}

</mosaic_0001>

<bundles_post_ra>
// kernel: tpu_custom_call.1
= control target key start
LH: loop header
LB: loop body
LE: loop exit
PB: predicated region body
PF: predicated region fallthrough
CT: control target
= control target key end

     0   :  { %8 = vsyncpa [#allocation3], 0  ;;  %s401_s0 = inlined_call_operand.hbm [shape: f32[1,128], index: 0, kind: input, shape index: {}]   ;;  %s402_s1 = inlined_call_operand.hbm [shape: f32[16,128], index: 1, kind: output, shape index: {0}]   ;;  %s403_s2 = inlined_call_operand.hbm [shape: f32[1,128], index: 2, kind: output, shape index: {1}]  }
   0x1   :  { %9 = vsyncpa [#allocation4], 0 }
   0x2   :  { %10 = vsyncpa [#allocation7], 0  ;;  %s299_s9 = smov [#allocation2]   ;;  %s227_s13 = scalar_lea.hbm %s401_s0, 16 }
   0x3   :  { %s17_s10 = sshll.u32 %s299_s9, 4  ;;  %p228_p0 = scmp.ne.s32.totalorder %s401_s0, %s227_s13  ;;  %s18_s10 = int_to_ptr.vmem [resolvable:$true] %s17_s10 }
   0x4   :  { %p231_p1 = scmp.lt.u32.totalorder %s227_s13, %s401_s0 }
   0x6   :  { %p233_p2 = pnand %p231_p1, %p228_p0 }
   0x8   :  { %236 = shalt.err (!%p233_p2)
}
   0x9   :  { %s237_s18 = scalar_lea.vmem %s18_s10, 16  ;;  %s241_s19 = scalar_lea.vmem %s18_s10, 32 }
   0xa   :  { %p238_p3 = scmp.ne.s32.totalorder %s18_s10, %s237_s18  ;;  %p242_p4 = scmp.lt.s32.totalorder %s18_s10, %s18_s10 }
   0xb   :  { %p243_p5 = scmp.lt.s32.totalorder %s241_s19, %s237_s18 }
   0xd   :  { %p244_p6 = por %p243_p5, %p242_p4 }
   0xf   :  { %p245_p7 = pnand %p244_p6, %p238_p3 }
  0x11   :  { %248 = shalt.err (!%p245_p7)
}
  0x12   :  { %20 = dma.hbm_to_vmem [thread:$0]  %s401_s0, 16, %s18_s10, [#allocation3]  }
  0x13   :  { %293 = dma.done.wait [#allocation3], 16  }
  0x14   :  { %294 = vsyncadd [#allocation3], 4294967280  ;;  %v29_v0 = vlaneseq  ;;  %v337_v2 = vld [vmem:[#allocation2] sm:$0x1]  ;;  %v300_v27 = vmov 683565275  }
  0x15   :  { %v25_v3 = vsub.f32 0.0, %v337_v2  ;;  %v341_v4 = vmul.f32 6.2831855, %v337_v2  ;;  %v301_v29 = vmov 2475754826   ;;  %s306_s0 = smov [#allocation5]  }
  0x16   :  { %v30_v1 = vshrl.u32 %v29_v0, 7  ;;  %v302_v31 = vmov 2131351028   ;;  %v303_v34 = vmov 2102212464   ;;  %s172_s22 = sshll.u32 %s306_s0, 4  ;;  %s173_s22 = int_to_ptr.vmem [resolvable:$true] %s172_s22 }
  0x17   :  { %v26_v5 = vmul.f32 10.0, %v25_v3  ;;  %v59_v7 = vand.u32 2147483647, %v341_v4  ;;  %v62_v8 = vand.u32 2139095040, %v341_v4  ;;  %v304_v36 = vmov 920167782   ;;  %p254_p9 = scmp.lt.s32.totalorder %s173_s22, %s173_s22 }
  0x18   :  { %v31_v6 = vadd.s32 8, %v30_v1  ;;  %v32_v11 = vcvt.s32.f32 %v30_v1  ;;  %v41_v20 = vsub.s32 0, %v30_v1  ;;  %v305_v44 = vmov 1326507024   ;;  %s249_s23 = scalar_lea.vmem %s173_s22, 256 }
  0x19   :  { %v27_v9 = vmul.f32 1.442695, %v26_v5  ;;  %v63_v10 = vshrl.u32 %v62_v8, 23  ;;  %v66_v13 = vand.u32 8388607, %v59_v7  ;;  %p250_p8 = scmp.ne.s32.totalorder %s173_s22, %s249_s23  ;;  %p255_p10 = scmp.lt.s32.totalorder %s249_s23, %s249_s23 }
  0x1a   :  { %v33_v12 = vcvt.s32.f32 %v31_v6  ;;  %v34_v16 = vmul.f32 0.06621747, %v32_v11 }
  0x1b   :  { %217 = vpow2.f32 %v27_v9  ;;  %v198_v14 = vadd.s32 4294967169, %v63_v10  ;;  %v67_v18 = vor.u32 8388608, %v66_v13  ;;  %p256_p11 = por %p255_p10, %p254_p9 }
  0x1c   :  { %v35_v17 = vmul.f32 0.06621747, %v33_v12  ;;  %v36_v23 = vadd.f32 0.006737947, %v34_v16 }
  0x1d   :  { %v69_v15 = vadd.s32 1, %v198_v14  ;;  %v347_v25 = vshll.u32 %v67_v18, 8  ;;  %p257_p12 = pnand %p256_p11, %p250_p8 }
  0x1e   :  { %v37_v24 = vadd.f32 0.006737947, %v35_v17 }
  0x1f   :  { %vm70_vm0 = vcmp.gt.s32.totalorder %v69_v15, 0 }
  0x20   :  { %v71_v19 = vsel %vm70_vm0, %v69_v15, 0 }
  0x21   :  { %v72_v21 = vshrl.u32 %v71_v19, 5  ;;  %v73_v22 = vand.u32 31, %v71_v19 }
  0x23   :  { %v74_v26 = vsub.s32 32, %v73_v22  ;;  %v76_v28 = vshll.u32 %v300_v27, %v73_v22  ;;  %v79_v30 = vshll.u32 %v301_v29, %v73_v22  ;;  %v82_v32 = vshll.u32 %v302_v31, %v73_v22 }
  0x24   :  { %v85_v35 = vshll.u32 %v303_v34, %v73_v22  ;;  %v88_v37 = vshll.u32 %v304_v36, %v73_v22  ;;  %vm91_vm1 = vcmp.lt.s32.totalorder %v72_v21, 1  ;;  %vm92_vm2 = vcmp.lt.s32.totalorder %v72_v21, 2 }
  0x25   :  { %v218_v33 = vpop.eup %217  ;;  %v75_v39 = vshrl.u32 %v300_v27, %v74_v26  ;;  %v77_v40 = vshrl.u32 %v301_v29, %v74_v26  ;;  %v80_v41 = vshrl.u32 %v302_v31, %v74_v26  ;;  %v83_v42 = vshrl.u32 %v303_v34, %v74_v26 }
  0x26   :  { %v42_v38 = vrot.slane %v218_v33, %v41_v20  ;;  %v86_v43 = vshrl.u32 %v304_v36, %v74_v26  ;;  %v89_v45 = vshrl.u32 %v305_v44, %v74_v26  ;;  %vm93_vm3 = vcmp.lt.s32.totalorder %v72_v21, 3 }
  0x27   :  { %v78_v48 = vor.u32 %v77_v40, %v76_v28  ;;  %v81_v49 = vor.u32 %v80_v41, %v79_v30  ;;  %v84_v50 = vor.u32 %v83_v42, %v82_v32  ;;  %vm94_vm4 = vcmp.lt.s32.totalorder %v72_v21, 4 }
  0x28   :  { %v44_v46 = vsub.f32 %v42_v38, %v36_v23  ;;  %v45_v47 = vsub.f32 %v42_v38, %v37_v24  ;;  %v87_v51 = vor.u32 %v86_v43, %v85_v35  ;;  %v90_v52 = vor.u32 %v89_v45, %v88_v37 }
  0x29   :  { %v95_v55 = vsel %vm91_vm1, %v75_v39, %v78_v48  ;;  %v99_v56 = vsel %vm91_vm1, %v78_v48, %v81_v49  ;;  %v96_v57 = vsel %vm94_vm4, %v84_v50, 2102212464  ;;  %v103_v59 = vsel %vm91_vm1, %v81_v49, %v84_v50 }
  0x2a   :  { %v46_v53 = vmul.f32 8.054269, %v44_v46  ;;  %v47_v54 = vmul.f32 8.054269, %v45_v47  ;;  %v100_v58 = vsel %vm94_vm4, %v87_v51, 920167782  ;;  %v97_v63 = vsel %vm93_vm3, %v81_v49, %v96_v57 }
  0x2b   :  { %v104_v60 = vsel %vm94_vm4, %v90_v52, 1326507024  ;;  %v101_v0 = vsel %vm93_vm3, %v84_v50, %v100_v58  ;;  %v98_v8 = vsel %vm92_vm2, %v95_v55, %v97_v63 }
  0x2c   :  { %v48_v61 = vmul.f32 %v46_v53, %v46_v53  ;;  %v49_v62 = vmul.f32 %v47_v54, %v47_v54  ;;  %v102_v1 = vsel %vm92_vm2, %v99_v56, %v101_v0  ;;  %v105_v3 = vsel %vm93_vm3, %v87_v51, %v104_v60 }
  0x2d   :  { %v106_v9 = vsel %vm92_vm2, %v103_v59, %v105_v3  ;;  %v363_v12 = vmul.u32.u64.low %v347_v25, %v102_v1  ;;  %v364_v13 = vmul.u32.u64.high %v347_v25, %v102_v1, %v363_v12  ;;  %v114_v16 = vmul.u32 %v347_v25, %v98_v8 }
  0x2e   :  { %v50_v5 = vsub.f32 0.0, %v48_v61  ;;  %v51_v6 = vsub.f32 0.0, %v49_v62  ;;  %v359_v10 = vmul.u32.u64.low %v347_v25, %v106_v9  ;;  %v360_v11 = vmul.u32.u64.high %v347_v25, %v106_v9, %v359_v10 }
  0x2f   :  { %v117_v17 = vadd.s32 1, %v364_v13 }
  0x30   :  { %v52_v14 = vmul.f32 1.442695, %v50_v5  ;;  %v54_v15 = vmul.f32 1.442695, %v51_v6  ;;  %vm116_vm5 = vc.u32 %v360_v11, %v363_v12 }
  0x31   :  { %v118_v18 = vsel %vm116_vm5, %v117_v17, %v364_v13 }
  0x32   :  { %219 = vpow2.f32 %v52_v14  ;;  %v119_v19 = vadd.s32 %v118_v18, %v114_v16 }
  0x33   :  { %221 = vpow2.f32 %v54_v15 }
  0x34   :  { %v120_v20 = vadd.s32 536870912, %v119_v19 }
  0x36   :  { %v121_v21 = vshrl.u32 %v120_v20, 30 }
  0x38   :  { %v122_v23 = vshll.u32 %v121_v21, 30 }
  0x3a   :  { %v123_v26 = vsub.s32 %v119_v19, %v122_v23 }
  0x3c   :  { %v220_v22 = vpop.eup %219 }
  0x3d   :  { %v222_v24 = vpop.eup %221  ;;  %56 = vst [vmem:[#allocation5] sm:$0xff] %v220_v22 }
  0x3e   :  { %57 = vst [vmem:[#allocation5 + $0x8] sm:$0xff] %v222_v24 }
  0x3f   :  { %260 = shalt.err (!%p257_p12)
}
  0x40   :  { %s261_s26 = scalar_lea.hbm %s402_s1, 256 }
  0x41   :  { %p262_p13 = scmp.ne.s32.totalorder %s402_s1, %s261_s26  ;;  %p265_p0 = scmp.lt.u32.totalorder %s261_s26, %s402_s1 }
  0x43   :  { %p267_p1 = pnand %p265_p0, %p262_p13 }
  0x45   :  { %270 = shalt.err (!%p267_p1)
}
  0x46   :  { %s307_s3 = smov 128   ;;  %s308_s4 = smov 8   ;;  %v125_v25 = vsub.s32 0, %v123_v26  ;;  %v115_v30 = vadd.s32 %v363_v12, %v360_v11  ;;  %vm61_vm7 = vcmp.lt.s32.totalorder %v341_v4, 0  ;;  %vm60_vm8 = vcmp.le.f32.partialorder %v59_v7, 0.7853982 }
  0x47   :  { %178 = dma.vmem_to_hbm [thread:$0]  %s173_s22, 256, %s402_s1, [#allocation4], %s307_s3, %s307_s3, %s308_s4   ;;  %v145_v44 = vsub.s32 4, %v121_v21  ;;  %vm151_vm12 = vweird.f32 %v341_v4  ;;  %vm164_vm13 = vcmp.lt.f32.partialorder %v337_v2, 0.5 }
  0x48   :  { %v199_v27 = vmin.u32 %v125_v25, %v123_v26  ;;  %s309_s1 = smov [#allocation6]  }
  0x49   :  { %v146_v47 = vsel %vm61_vm7, %v145_v44, %v121_v21  ;;  %s185_s7 = sshll.u32 %s309_s1, 4  ;;  %s186_s7 = int_to_ptr.vmem [resolvable:$true] %s185_s7 }
  0x4a   :  { %v127_v28 = vclz %v199_v27  ;;  %v148_v48 = vsel %vm60_vm8, 0, %v146_v47  ;;  %s271_s8 = scalar_lea.vmem %s186_s7, 16  ;;  %s275_s9 = scalar_lea.vmem %s186_s7, 32 }
  0x4b   :  { %v152_v49 = vand.u32 3, %v148_v48  ;;  %p272_p2 = scmp.ne.s32.totalorder %s186_s7, %s271_s8  ;;  %p276_p3 = scmp.lt.s32.totalorder %s186_s7, %s186_s7 }
  0x4c   :  { %v200_v29 = vadd.s32 4294967294, %v127_v28  ;;  %p277_p4 = scmp.lt.s32.totalorder %s275_s9, %s271_s8 }
  0x4d   :  { %vm157_vm9 = vcmp.eq.s32.totalorder %v152_v49, 2  ;;  %vm154_vm10 = vcmp.eq.s32.totalorder %v152_v49, 0  ;;  %vm153_vm11 = vcmp.lt.s32.totalorder %v152_v49, 2 }
  0x4e   :  { %vm201_vm6 = vcmp.lt.s32.totalorder %v200_v29, 0  ;;  %p278_p5 = por %p277_p4, %p276_p3 }
  0x4f   :  { %v130_v31 = vsel %vm201_vm6, 0, %v200_v29 }
  0x50   :  { %v131_v32 = vsub.s32 32, %v130_v31  ;;  %v132_v33 = vshll.u32 %v123_v26, %v130_v31  ;;  %v135_v34 = vsub.s32 4294967266, %v130_v31  ;;  %p279_p6 = pnand %p278_p5, %p272_p2 }
  0x52   :  { %v133_v35 = vshrl.u32 %v115_v30, %v131_v32  ;;  %v136_v36 = vadd.s32 127, %v135_v34 }
  0x54   :  { %v134_v37 = vor.u32 %v133_v35, %v132_v33  ;;  %v137_v38 = vshll.u32 %v136_v36, 23 }
  0x56   :  { %v138_v39 = vor.u32 4788187, %v137_v38  ;;  %v141_v40 = vcvt.s32.f32 %v134_v37 }
  0x58   :  { %v139_v41 = vand.u32 2147483647, %v138_v39 }
  0x5a   :  { %v142_v42 = vmul.f32 %v141_v40, %v139_v41 }
  0x5c   :  { %v143_v43 = vxor.u32 2147483648, %v142_v42 }
  0x5e   :  { %v144_v45 = vsel %vm61_vm7, %v143_v43, %v142_v42 }
  0x5f   :  { %v147_v46 = vsel %vm60_vm8, %v341_v4, %v144_v45 }
  0x60   :  { %223 = vcosq.f32 %v147_v46 }
  0x61   :  { %225 = vsinq.f32 %v147_v46 }
  0x6a   :  { %v224_v50 = vpop.eup %223 }
  0x6b   :  { %v226_v51 = vpop.eup %225  ;;  %v158_v52 = vxor.u32 2147483648, %v224_v50 }
  0x6c   :  { %v155_v53 = vxor.u32 2147483648, %v226_v51 }
  0x6d   :  { %v159_v7 = vsel %vm157_vm9, %v158_v52, %v226_v51 }
  0x6e   :  { %v156_v54 = vsel %vm154_vm10, %v224_v50, %v155_v53 }
  0x6f   :  { %v160_v55 = vsel %vm153_vm11, %v156_v54, %v159_v7 }
  0x70   :  { %v161_v56 = vsel %vm151_vm12, nan, %v160_v55 }
  0x71   :  { %v162_v57 = vadd.f32 1.0, %v161_v56 }
  0x73   :  { %v163_v58 = vmul.f32 0.5, %v162_v57 }
  0x75   :  { %v165_v59 = vsel %vm164_vm13, %v163_v58, 0.0 }
  0x76   :  { %166 = vst [vmem:[#allocation6] sm:$0x1] %v165_v59 }
  0x77   :  { %282 = shalt.err (!%p279_p6)
}
  0x78   :  { %s283_s12 = scalar_lea.hbm %s403_s2, 16 }
  0x79   :  { %p284_p7 = scmp.ne.s32.totalorder %s403_s2, %s283_s12  ;;  %p287_p8 = scmp.lt.u32.totalorder %s283_s12, %s403_s2 }
  0x7b   :  { %p289_p9 = pnand %p287_p8, %p284_p7 }
  0x7d   :  { %292 = shalt.err (!%p289_p9)
}
  0x7e   :  { %188 = dma.vmem_to_hbm [thread:$0]  %s186_s7, 16, %s403_s2, [#allocation7]  }
  0x7f   :  { %295 = dma.done.wait [#allocation4], 256  }
  0x80   :  { %296 = vsyncadd [#allocation4], 4294967040 }
  0x81   :  { %297 = dma.done.wait [#allocation7], 16  }
  0x82   :  { %298 = vsyncadd [#allocation7], 4294967280 }
  0x83   :  { %195 = vsyncpa [#allocation3], 1 }
  0x84   :  { %196 = vsyncpa [#allocation4], 1 }
  0x85   :  { %197 = vsyncpa [#allocation7], 1 }

</bundles_post_ra>
